<compile_context>
chip_gen: v6e
topology: v6e:2x2x1
jax: 0.10.0
libtpu: 0.0.40
codegen_flags: <defaults>
</compile_context>

<pallas_src>
import functools

import jax
import jax.numpy as jnp
from jax import lax
from jax.experimental import pallas as pl
from jax.experimental.pallas import tpu as pltpu


def make_attn_kernel(method: str):
    """Pallas kernel implementing Attn.forward for a fixed (static) method."""

    def kernel(hidden_ref, enc_ref, w_hid_ref, w_enc_ref, b_ref, v_ref, out_ref):
        hidden = hidden_ref[...]                    # (tb, H)
        enc = enc_ref[...]                          # (L, tb, H)  native layout
        L, tb, H = enc.shape

        if method == "dot":
            # scores[b,l] = sum_h hidden[b,h] * enc[l,b,h]
            scores_lb = jnp.sum(enc * hidden[None, :, :], axis=2)       # (L, tb)
            scores = scores_lb.T                                        # (tb, L)
        elif method == "general":
            # energy = enc @ W^T + bias ; scores = sum_h hidden * energy
            #        = sum_k enc[l,b,k] * (hidden @ W)[b,k] + hidden[b,:] @ bias
            hW = lax.dot_general(hidden, w_hid_ref[...],
                                 (((1,), (0,)), ((), ())),
                                 preferred_element_type=jnp.float32)    # (tb, H)
            hb = jnp.sum(hidden * b_ref[...], axis=1, keepdims=True)    # (tb, 1)
            scores_lb = jnp.sum(enc * hW[None, :, :], axis=2)           # (L, tb)
            scores = scores_lb.T + hb                                   # (tb, L)
        else:  # concat
            # energy = tanh(hidden @ Wh^T + enc @ We^T + bias); score = sum v*energy
            hid_proj = lax.dot_general(hidden, w_hid_ref[...],
                                       (((1,), (1,)), ((), ())),
                                       preferred_element_type=jnp.float32)
            hid_proj = hid_proj + b_ref[...]                            # (tb, H)
            enc2d = enc.reshape(L * tb, H)
            enc_proj = lax.dot_general(enc2d, w_enc_ref[...],
                                       (((1,), (1,)), ((), ())),
                                       preferred_element_type=jnp.float32)
            enc_proj = enc_proj.reshape(L, tb, H)
            energy = jnp.tanh(enc_proj + hid_proj[None, :, :])          # (L, tb, H)
            scores_lb = jnp.sum(v_ref[...][None] * energy, axis=2)      # (L, tb)
            scores = scores_lb.T                                        # (tb, L)

        # softmax over the sequence axis (last axis -> lane reduce)
        m = jnp.max(scores, axis=1, keepdims=True)                      # (tb, 1)
        e = jnp.exp(scores - m)                                         # (tb, L)
        s = jnp.sum(e, axis=1, keepdims=True)                           # (tb, 1)
        inv = pl.reciprocal(s, approx=False)                            # 1 recip/row
        out_ref[...] = (e * inv).astype(out_ref.dtype)                  # (tb, L)

    return kernel


def _pick_block_b(batch, seq, hidden, itemsize=4, enc_block_budget=4 * 1024 * 1024):
    """Largest batch tile whose enc block fits the per-buffer VMEM budget."""
    per_batch_row = seq * hidden * itemsize
    tb = max(1, enc_block_budget // max(per_batch_row, 1))
    if tb >= batch:
        return batch
    tb = max(8, (tb // 8) * 8)      # sublane-aligned when smaller than full B
    return min(tb, batch)


@functools.partial(jax.jit, static_argnums=0)
def attn_pallas(method, hidden_1bh, enc_lbh, w, b, v):
    """Mirrors Attn.forward.

    hidden_1bh: (1, B, H)   enc_lbh: (L, B, H)   ->   (B, 1, L) attn weights.
    """
    L, B, H = enc_lbh.shape
    hidden_bh = hidden_1bh[0]                      # (B, H)
    b2 = b.reshape(1, H)
    v2 = v.reshape(1, H)
    if method == "concat":
        w_hid = w[:, :H]                           # (H, H) - split in wrapper (free)
        w_enc = w[:, H:]                           # (H, H)
    else:
        w_hid = w                                  # (H, H); w_enc unused
        w_enc = w

    tb = _pick_block_b(B, L, H)
    grid = (pl.cdiv(B, tb),)

    probs = pl.pallas_call(
        make_attn_kernel(method),
        out_shape=jax.ShapeDtypeStruct((B, L), jnp.float32),
        grid=grid,
        in_specs=[
            pl.BlockSpec((tb, H), lambda i: (i, 0)),        # hidden  (B, H)
            pl.BlockSpec((L, tb, H), lambda i: (0, i, 0)),  # enc     (L, B, H)
            pl.BlockSpec((H, H), lambda i: (0, 0)),         # w_hid
            pl.BlockSpec((H, H), lambda i: (0, 0)),         # w_enc
            pl.BlockSpec((1, H), lambda i: (0, 0)),         # bias
            pl.BlockSpec((1, H), lambda i: (0, 0)),         # v
        ],
        out_specs=pl.BlockSpec((tb, L), lambda i: (i, 0)),  # lane-dense (B, L)
        compiler_params=pltpu.CompilerParams(
            dimension_semantics=("parallel",),              # batch axis -> 2 TCs on v7x
            vmem_limit_bytes=32 * 1024 * 1024,
        ),
    )(hidden_bh, enc_lbh, w_hid, w_enc, b2, v2)

    return probs[:, None, :]                                # (B, 1, L) - free unsqueeze


def attn_reference(method, hidden_1bh, enc_lbh, w, b, v):
    """Pure-JAX reference following the PyTorch code verbatim."""
    if method == "dot":
        scores = jnp.sum(hidden_1bh * enc_lbh, axis=2)                 # (L, B)
    elif method == "general":
        energy = enc_lbh @ w.T + b
        scores = jnp.sum(hidden_1bh * energy, axis=2)
    else:  # concat
        hid = jnp.broadcast_to(hidden_1bh, enc_lbh.shape)
        cat = jnp.concatenate([hid, enc_lbh], axis=2)
        energy = jnp.tanh(cat @ w.T + b)
        scores = jnp.sum(v * energy, axis=2)
    scores = scores.T                                                  # (B, L)
    return jax.nn.softmax(scores, axis=1)[:, None, :]                  # (B, 1, L)


if __name__ == "__main__":
    # Small shapes consistent with the module: seq len L, batch B, hidden H.
    L, B, H = 8, 2, 32
    key = jax.random.PRNGKey(0)
    k1, k2, k3, k4, k5, k6, k7 = jax.random.split(key, 7)

    hidden = jax.random.normal(k1, (1, B, H), jnp.float32)     # decoder hidden
    enc_out = jax.random.normal(k2, (L, B, H), jnp.float32)    # encoder outputs

    # Deterministic parameter init (shapes from Attn.__init__).
    w_general = 0.1 * jax.random.normal(k3, (H, H), jnp.float32)      # Linear(H,H).weight
    b_general = 0.1 * jax.random.normal(k4, (H,), jnp.float32)        # Linear(H,H).bias
    w_concat = 0.1 * jax.random.normal(k5, (H, 2 * H), jnp.float32)   # Linear(2H,H).weight
    b_concat = 0.1 * jax.random.normal(k6, (H,), jnp.float32)         # Linear(2H,H).bias
    v_param = 0.1 * jax.random.normal(k7, (H,), jnp.float32)          # self.v

    dummy_w = jnp.zeros((H, H), jnp.float32)
    dummy_b = jnp.zeros((H,), jnp.float32)
    dummy_v = jnp.zeros((H,), jnp.float32)

    configs = {
        "dot": (dummy_w, dummy_b, dummy_v),
        "general": (w_general, b_general, dummy_v),
        "concat": (w_concat, b_concat, v_param),
    }

    for method, (w, b, v) in configs.items():
        out = attn_pallas(method, hidden, enc_out, w, b, v)
        out = jax.block_until_ready(out)
        ref = attn_reference(method, hidden, enc_out, w, b, v)
        assert out.shape == (B, 1, L), (method, out.shape)
        assert jnp.allclose(out, ref, atol=1e-5, rtol=1e-5), (
            f"mismatch for method={method}"
        )
        # attention weights sum to 1 along the sequence axis
        assert jnp.allclose(jnp.sum(out, axis=2), 1.0, atol=1e-5)

    print("KERNEL_OK")
</pallas_src>

<mosaic_0001>
module attributes {stable_mosaic.version = 11 : i64} {
  func.func @kernel(%arg0: i32, %arg1: memref<2x32xf32, #tpu.memory_space<vmem>>, %arg2: memref<8x2x32xf32, #tpu.memory_space<vmem>>, %arg3: memref<32x32xf32, #tpu.memory_space<vmem>>, %arg4: memref<32x32xf32, #tpu.memory_space<vmem>>, %arg5: memref<1x32xf32, #tpu.memory_space<vmem>>, %arg6: memref<1x32xf32, #tpu.memory_space<vmem>>, %arg7: memref<2x8xf32, #tpu.memory_space<vmem>>) attributes {dimension_semantics = [#tpu.dimension_semantics<parallel>], iteration_bounds = array<i64: 1>, scalar_prefetch = 0 : i64, scratch_operands = 0 : i64, tpu.core_type = #tpu.core_type<tc>, window_params = [{transform_indices = @transform_0, window_bounds = array<i64: 2, 32>}, {transform_indices = @transform_1, window_bounds = array<i64: 8, 2, 32>}, {pipeline_mode = #tpu.pipeline_mode<synchronous>, transform_indices = @transform_2, window_bounds = array<i64: 32, 32>}, {pipeline_mode = #tpu.pipeline_mode<synchronous>, transform_indices = @transform_3, window_bounds = array<i64: 32, 32>}, {pipeline_mode = #tpu.pipeline_mode<synchronous>, transform_indices = @transform_4, window_bounds = array<i64: 1, 32>}, {pipeline_mode = #tpu.pipeline_mode<synchronous>, transform_indices = @transform_5, window_bounds = array<i64: 1, 32>}, {transform_indices = @transform_6, window_bounds = array<i64: 2, 8>}]} {
    %c0 = arith.constant 0 : index
    %c0_0 = arith.constant 0 : index
    %0 = vector.load %arg1[%c0, %c0_0] : memref<2x32xf32, #tpu.memory_space<vmem>>, vector<2x32xf32>
    %c0_1 = arith.constant 0 : index
    %c0_2 = arith.constant 0 : index
    %c0_3 = arith.constant 0 : index
    %1 = vector.load %arg2[%c0_1, %c0_2, %c0_3] : memref<8x2x32xf32, #tpu.memory_space<vmem>>, vector<8x2x32xf32>
    %2 = vector.shape_cast %0 : vector<2x32xf32> to vector<1x2x32xf32>
    %3 = vector.broadcast %2 : vector<1x2x32xf32> to vector<8x2x32xf32>
    %4 = arith.mulf %1, %3 : vector<8x2x32xf32>
    %cst = arith.constant dense<0.000000e+00> : vector<8x2xf32>
    %5 = vector.multi_reduction <add>, %4, %cst [2] : vector<8x2x32xf32> to vector<8x2xf32>
    %6 = tpu.transpose %5, [1, 0] : vector<8x2xf32> -> vector<2x8xf32>
    %cst_4 = arith.constant dense<0xFF800000> : vector<2xf32>
    %7 = vector.multi_reduction <maximumf>, %6, %cst_4 [1] : vector<2x8xf32> to vector<2xf32>
    %8 = vector.shape_cast %7 : vector<2xf32> to vector<2x1xf32>
    %9 = vector.broadcast %8 : vector<2x1xf32> to vector<2x8xf32>
    %10 = arith.subf %6, %9 : vector<2x8xf32>
    %11 = math.exp %10 : vector<2x8xf32>
    %cst_5 = arith.constant dense<0.000000e+00> : vector<2xf32>
    %12 = vector.multi_reduction <add>, %11, %cst_5 [1] : vector<2x8xf32> to vector<2xf32>
    %13 = vector.shape_cast %12 : vector<2xf32> to vector<2x1xf32>
    %14 = tpu.reciprocal %13 : vector<2x1xf32> -> vector<2x1xf32>
    %15 = vector.broadcast %14 : vector<2x1xf32> to vector<2x8xf32>
    %16 = arith.mulf %11, %15 : vector<2x8xf32>
    %c0_6 = arith.constant 0 : index
    %c0_7 = arith.constant 0 : index
    %17 = vector.load %arg7[%c0_6, %c0_7] : memref<2x8xf32, #tpu.memory_space<vmem>>, vector<2x8xf32>
    tpu.vector_store %arg7[%c0_6, %c0_7], %16 {strides = array<i32>} : memref<2x8xf32, #tpu.memory_space<vmem>>, vector<2x8xf32>,
    return
  }
  func.func @transform_0(%arg0: i32) -> (i32, i32) {
    %c0_i32 = arith.constant 0 : i32
    %c0_i32_0 = arith.constant 0 : i32
    return %arg0, %c0_i32 : i32, i32
  }
  func.func @transform_1(%arg0: i32) -> (i32, i32, i32) {
    %c0_i32 = arith.constant 0 : i32
    %c0_i32_0 = arith.constant 0 : i32
    %c0_i32_1 = arith.constant 0 : i32
    return %c0_i32, %arg0, %c0_i32_0 : i32, i32, i32
  }
  func.func @transform_2(%arg0: i32) -> (i32, i32) {
    %c0_i32 = arith.constant 0 : i32
    %c0_i32_0 = arith.constant 0 : i32
    %c0_i32_1 = arith.constant 0 : i32
    return %c0_i32, %c0_i32_0 : i32, i32
  }
  func.func @transform_3(%arg0: i32) -> (i32, i32) {
    %c0_i32 = arith.constant 0 : i32
    %c0_i32_0 = arith.constant 0 : i32
    %c0_i32_1 = arith.constant 0 : i32
    return %c0_i32, %c0_i32_0 : i32, i32
  }
  func.func @transform_4(%arg0: i32) -> (i32, i32) {
    %c0_i32 = arith.constant 0 : i32
    %c0_i32_0 = arith.constant 0 : i32
    %c0_i32_1 = arith.constant 0 : i32
    return %c0_i32, %c0_i32_0 : i32, i32
  }
  func.func @transform_5(%arg0: i32) -> (i32, i32) {
    %c0_i32 = arith.constant 0 : i32
    %c0_i32_0 = arith.constant 0 : i32
    %c0_i32_1 = arith.constant 0 : i32
    return %c0_i32, %c0_i32_0 : i32, i32
  }
  func.func @transform_6(%arg0: i32) -> (i32, i32) {
    %c0_i32 = arith.constant 0 : i32
    %c0_i32_0 = arith.constant 0 : i32
    return %arg0, %c0_i32 : i32, i32
  }
}

</mosaic_0001>

<bundles_post_ra>
// kernel: attn_pallas.1
= control target key start
LH: loop header
LB: loop body
LE: loop exit
PB: predicated region body
PF: predicated region fallthrough
CT: control target
= control target key end

     0   :  { %11 = vsyncpa [#allocation3], 0  ;;  %s393_s0 = inlined_call_operand.vmem [shape: f32[2,32], index: 0, kind: input, shape index: {}]   ;;  %s394_s1 = inlined_call_operand.hbm [shape: f32[8,2,32], index: 1, kind: input, shape index: {}]   ;;  %s395_s2 = inlined_call_operand.hbm [shape: f32[32,32], index: 2, kind: input, shape index: {}, may-alias: {2,3}]   ;;  %s396_s3 = inlined_call_operand.hbm [shape: f32[32,32], index: 3, kind: input, shape index: {}, may-alias: {2,3}]   ;;  %s397_s4 = inlined_call_operand.vmem [shape: f32[1,32], index: 4, kind: input, shape index: {}]   ;;  %s398_s5 = inlined_call_operand.vmem [shape: f32[1,32], index: 5, kind: input, shape index: {}]   ;;  %s399_s6 = inlined_call_operand.hbm [shape: f32[2,8], index: 6, kind: output, shape index: {}]  }
   0x1   :  { %12 = vsyncpa [#allocation6], 0 }
   0x2   :  { %13 = vsyncpa [#allocation4], 0  ;;  %s324_s21 = smov [#allocation5]  }
   0x3   :  { %s33_s22 = sshll.u32 %s324_s21, 4  ;;  %s34_s22 = int_to_ptr.vmem [resolvable:$true] %s33_s22 }
   0x4   :  { %s246_s23 = scalar_lea.vmem %s34_s22, 512  ;;  %p251_p1 = scmp.lt.s32.totalorder %s34_s22, %s34_s22 }
   0x5   :  { %p247_p0 = scmp.ne.s32.totalorder %s34_s22, %s246_s23  ;;  %p252_p2 = scmp.lt.s32.totalorder %s246_s23, %s246_s23 }
   0x7   :  { %p253_p3 = por %p252_p2, %p251_p1 }
   0x9   :  { %p254_p4 = pnand %p253_p3, %p247_p0 }
   0xb   :  { %257 = shalt.err (!%p254_p4)
}
   0xc   :  { %s325_s4 = smov 128   ;;  %s326_s24 = smov 8  }
   0xd   :  { %39 = dma.hbm_to_vmem [thread:$0]  %s395_s2, 512, %s34_s22, [#allocation6], %s325_s4, %s325_s4, %s326_s24  }
   0xe   :  { %s327_s26 = smov [#allocation2]  }
   0xf   :  { %s21_s27 = sshll.u32 %s327_s26, 4  ;;  %s22_s27 = int_to_ptr.vmem [resolvable:$true] %s21_s27 }
  0x10   :  { %s266_s28 = scalar_lea.vmem %s22_s27, 256  ;;  %p271_p6 = scmp.lt.s32.totalorder %s22_s27, %s22_s27 }
  0x11   :  { %p267_p5 = scmp.ne.s32.totalorder %s22_s27, %s266_s28  ;;  %p272_p7 = scmp.lt.s32.totalorder %s266_s28, %s266_s28 }
  0x13   :  { %p273_p8 = por %p272_p7, %p271_p6 }
  0x15   :  { %p274_p9 = pnand %p273_p8, %p267_p5 }
  0x17   :  { %277 = shalt.err (!%p274_p9)
}
  0x18   :  { %s328_s29 = smov 32   ;;  %s329_s30 = smov 2  }
  0x19   :  { %27 = dma.hbm_to_vmem [thread:$0]  %s394_s1, 256, %s22_s27, [#allocation3], %s328_s29, %s328_s29, %s329_s30  }
  0x1a   :  { %s330_s9 = smov [#allocation7]  }
  0x1b   :  { %s45_s10 = sshll.u32 %s330_s9, 4  ;;  %s46_s10 = int_to_ptr.vmem [resolvable:$true] %s45_s10 }
  0x1c   :  { %s286_s2 = scalar_lea.vmem %s46_s10, 512  ;;  %p291_p11 = scmp.lt.s32.totalorder %s46_s10, %s46_s10 }
  0x1d   :  { %p287_p10 = scmp.ne.s32.totalorder %s46_s10, %s286_s2  ;;  %p292_p12 = scmp.lt.s32.totalorder %s286_s2, %s286_s2 }
  0x1f   :  { %p293_p13 = por %p292_p12, %p291_p11 }
  0x21   :  { %p294_p0 = pnand %p293_p13, %p287_p10 }
  0x23   :  { %297 = shalt.err (!%p294_p0)
}
  0x24   :  { %51 = dma.hbm_to_vmem [thread:$0]  %s396_s3, 512, %s46_s10, [#allocation6], %s325_s4, %s325_s4, %s326_s24  }
  0x25   :  { %318 = dma.done.wait [#allocation3], 256  }
  0x26   :  { %319 = vsyncadd [#allocation3], 4294967040 }
  0x27   :  { %320 = dma.done.wait [#allocation6], 1024  }
  0x28   :  { %321 = vsyncadd [#allocation6], 4294966272  ;;  %vm82_vm0 = vcmask 254976   ;;  %v65_v0 = vld [vmem:[%s393_s0] sm:$0x3]  ;;  %v115_v25 = vlaneseq  ;;  %vm149_vm1 = vcmask 1041409  }
  0x29   :  { %v66_v1 = vld [vmem:[#allocation2] sm:$0x3]  ;;  %v68_v2 = vld [vmem:[#allocation2 + $0x4] sm:$0x3]  ;;  %v67_v5 = vld [vmem:[#allocation2 + $0x2] sm:$0x3] }
  0x2a   :  { %v74_v3 = vmul.f32 %v66_v1, %v65_v0  ;;  %v76_v4 = vmul.f32 %v68_v2, %v65_v0  ;;  %v69_v6 = vld [vmem:[#allocation2 + $0x6] sm:$0x3]  ;;  %v75_v7 = vmul.f32 %v67_v5, %v65_v0  ;;  %v70_v9 = vld [vmem:[#allocation2 + $0x8] sm:$0x3]  ;;  %v71_v10 = vld [vmem:[#allocation2 + $0xa] sm:$0x3] }
  0x2b   :  { %v77_v8 = vmul.f32 %v69_v6, %v65_v0  ;;  %v78_v15 = vmul.f32 %v70_v9, %v65_v0  ;;  %v79_v16 = vmul.f32 %v71_v10, %v65_v0  ;;  %v72_v17 = vld [vmem:[#allocation2 + $0xc] sm:$0x3]  ;;  %v73_v18 = vld [vmem:[#allocation2 + $0xe] sm:$0x3]  ;;  %v116_v26 = vand.u32 127, %v115_v25  ;;  %s331_s0 = smov [#allocation8]  }
  0x2c   :  { %v83_v11 = vsel %vm82_vm0, %v74_v3, 0.0  ;;  %v89_v12 = vsel %vm82_vm0, %v76_v4, 0.0  ;;  %v86_v13 = vsel %vm82_vm0, %v75_v7, 0.0  ;;  %v80_v21 = vmul.f32 %v72_v17, %v65_v0  ;;  %s215_s3 = sshll.u32 %s331_s0, 4  ;;  %s216_s3 = int_to_ptr.vmem [resolvable:$true] %s215_s3 }
  0x2d   :  { %84 = vadd.xlane.f32.xlu0 %v83_v11  ;;  %90 = vadd.xlane.f32.xlu1 %v89_v12  ;;  %v92_v14 = vsel %vm82_vm0, %v77_v8, 0.0  ;;  %v95_v19 = vsel %vm82_vm0, %v78_v15, 0.0  ;;  %v98_v20 = vsel %vm82_vm0, %v79_v16, 0.0  ;;  %v81_v22 = vmul.f32 %v73_v18, %v65_v0  ;;  %s298_s14 = scalar_lea.vmem %s216_s3, 32  ;;  %p303_p2 = scmp.lt.s32.totalorder %s216_s3, %s216_s3 }
  0x2e   :  { %v101_v23 = vsel %vm82_vm0, %v80_v21, 0.0  ;;  %v118_v27 = vshrl.u32 %v115_v25, 7  ;;  %vm151_vm2 = vcmask 1042434   ;;  %vm153_vm3 = vcmask 1043459   ;;  %p299_p1 = scmp.ne.s32.totalorder %s216_s3, %s298_s14  ;;  %p304_p3 = scmp.lt.s32.totalorder %s298_s14, %s298_s14 }
  0x2f   :  { %v104_v24 = vsel %vm82_vm0, %v81_v22, 0.0  ;;  %vm155_vm4 = vcmask 1044484   ;;  %vm157_vm5 = vcmask 1045509   ;;  %vm159_vm6 = vcmask 1046534  }
  0x30   :  { %v119_v30 = vsub.s32 %v116_v26, %v118_v27  ;;  %vm161_vm7 = vcmask 1047559   ;;  %vm196_vm8 = vcmask 58368   ;;  %p305_p4 = por %p304_p3, %p303_p2 }
  0x31   :  { %87 = vadd.xlane.f32.xlu0 %v86_v13  ;;  %93 = vadd.xlane.f32.xlu1 %v92_v14 }
  0x32   :  { %p306_p5 = pnand %p305_p4, %p299_p1 }
  0x35   :  { %96 = vadd.xlane.f32.xlu0 %v95_v19  ;;  %99 = vadd.xlane.f32.xlu1 %v98_v20 }
  0x39   :  { %102 = vadd.xlane.f32.xlu0 %v101_v23  ;;  %105 = vadd.xlane.f32.xlu1 %v104_v24 }
  0xb6   :  { %v85_v28 = vpop.xlane.xlu0 %84  ;;  %v91_v29 = vpop.xlane.xlu1 %90 }
  0xb7   :  { %v120_v33 = vrot.slane %v85_v28, %v119_v30  ;;  %v128_v36 = vrot.slane %v91_v29, %v119_v30 }
  0xba   :  { %v88_v31 = vpop.xlane.xlu0 %87  ;;  %v94_v32 = vpop.xlane.xlu1 %93 }
  0xbb   :  { %v124_v34 = vrot.slane %v88_v31, %v119_v30  ;;  %v132_v35 = vrot.slane %v94_v32, %v119_v30 }
  0xbd   :  { %v150_v37 = vsel %vm149_vm1, %v124_v34, %v120_v33 }
  0xbe   :  { %v152_v38 = vsel %vm151_vm2, %v128_v36, %v150_v37  ;;  %v97_v39 = vpop.xlane.xlu0 %96  ;;  %v100_v40 = vpop.xlane.xlu1 %99 }
  0xbf   :  { %v154_v41 = vsel %vm153_vm3, %v132_v35, %v152_v38  ;;  %v136_v42 = vrot.slane %v97_v39, %v119_v30  ;;  %v140_v43 = vrot.slane %v100_v40, %v119_v30 }
  0xc1   :  { %v156_v44 = vsel %vm155_vm4, %v136_v42, %v154_v41 }
  0xc2   :  { %v103_v45 = vpop.xlane.xlu0 %102  ;;  %v106_v46 = vpop.xlane.xlu1 %105  ;;  %v158_v49 = vsel %vm157_vm5, %v140_v43, %v156_v44 }
  0xc3   :  { %v144_v47 = vrot.slane %v103_v45, %v119_v30  ;;  %v148_v48 = vrot.slane %v106_v46, %v119_v30 }
  0xc5   :  { %v160_v50 = vsel %vm159_vm6, %v144_v47, %v158_v49 }
  0xc6   :  { %v162_v51 = vsel %vm161_vm7, %v148_v48, %v160_v50 }
  0xc7   :  { %164 = vxpose.xlu0.b32.start.end [1/1] (short) (narrow) %v162_v51, 8 }
 0x143   :  { %v180_v52 = vpop.trf.xlu0 }
 0x144   :  { %v197_v53 = vsel %vm196_vm8, %v180_v52, -inf }
 0x145   :  { %198 = vmax.xlane.f32.xlu1 %v197_v53 }
 0x1ce   :  { %v199_v54 = vpop.xlane.xlu1 %198 }
 0x1cf   :  { %v200_v55 = vsub.f32 %v180_v52, %v199_v54 }
 0x1d1   :  { %v201_v56 = vmul.f32 1.442695, %v200_v55 }
 0x1d3   :  { %234 = vpow2.f32 %v201_v56 }
 0x1e0   :  { %v235_v57 = vpop.eup %234 }
 0x1e1   :  { %v203_v58 = vsel %vm196_vm8, %v235_v57, 0.0 }
 0x1e2   :  { %204 = vadd.xlane.f32.xlu1 %v203_v58 }
 0x26b   :  { %v205_v59 = vpop.xlane.xlu1 %204 }
 0x26c   :  { %236 = vrcp.f32 %v205_v59 }
 0x279   :  { %v237_v60 = vpop.eup %236 }
 0x27a   :  { %v207_v61 = vmul.f32 %v237_v60, %v235_v57 }
 0x27c   :  { %208 = vst.msk [vmem:[#allocation8] sm:$0x3] %vm196_vm8, %v207_v61 }
 0x27d   :  { %309 = shalt.err (!%p306_p5)
}
 0x27e   :  { %218 = dma.vmem_to_hbm [thread:$0]  %s216_s3, 32, %s399_s6, [#allocation4]  }
 0x27f   :  { %322 = dma.done.wait [#allocation4], 32  }
 0x280   :  { %323 = vsyncadd [#allocation4], 4294967264 }
 0x281   :  { %222 = vsyncpa [#allocation3], 1 }
 0x282   :  { %223 = vsyncpa [#allocation6], 1 }
 0x283   :  { %224 = vsyncpa [#allocation4], 1 }

</bundles_post_ra>
